<compile_context>
chip_gen: v7x
topology: tpu7x:2x2x1
jax: 0.10.0
libtpu: 0.0.40
codegen_flags: <defaults>
</compile_context>

<pallas_src>
import functools

import jax
import jax.numpy as jnp
from jax.experimental import pallas as pl
from jax.experimental.pallas import tpu as pltpu

HIGHEST = jax.lax.Precision.HIGHEST

_VMEM = pl.BlockSpec(memory_space=pltpu.MemorySpace.VMEM)


def _round_up(n, m):
    return (n + m - 1) // m * m


# ---------------------------------------------------------------------------
# Fused whole-sequence kernel: grid-less, time loop unrolled inside the body.
# ---------------------------------------------------------------------------
def rnn_sequence_kernel(xproj_ref, w1h_hi_ref, w1h_lo_ref, w2_ref, b2_ref,
                        out_ref, hfin_ref):
    seq = xproj_ref.shape[0]

    # Weights stay resident in VMEM; read once and reuse across the unrolled loop.
    w1h_hi = w1h_hi_ref[...]
    w1h_lo = w1h_lo_ref[...]

    # Reverse-time recurrence (forward_sequence iterates reversed(range(seq))).
    # First processed step has h0 == 0, so pre == xproj[seq-1]: skip the matmul.
    h = jnp.tanh(xproj_ref[seq - 1])

    for t in range(seq - 2, -1, -1):
        # bf16x3 split of h (VPU, off the MXU slot): 3 bf16 passes ~= fp32.
        h_hi = h.astype(jnp.bfloat16)
        h_lo = (h - h_hi.astype(jnp.float32)).astype(jnp.bfloat16)
        pre = (
            jnp.dot(h_hi, w1h_hi, preferred_element_type=jnp.float32)
            + jnp.dot(h_hi, w1h_lo, preferred_element_type=jnp.float32)
            + jnp.dot(h_lo, w1h_hi, preferred_element_type=jnp.float32)
            + xproj_ref[t]
        )
        h = jnp.tanh(pre)

    # h2o projection runs once, off the recurrence: full-precision dot is fine.
    out_ref[...] = (
        jnp.dot(h, w2_ref[...], preferred_element_type=jnp.float32,
                precision=HIGHEST)
        + b2_ref[...]
    )
    hfin_ref[...] = h


# ---------------------------------------------------------------------------
# Single-step kernel (module.forward).
# ---------------------------------------------------------------------------
def rnn_step_kernel(x_ref, h_ref, w1x_ref, w1h_ref, b1_ref, w2_ref, b2_ref,
                    out_ref, hnew_ref):
    pre = (
        jnp.dot(x_ref[...], w1x_ref[...], preferred_element_type=jnp.float32,
                precision=HIGHEST)
        + jnp.dot(h_ref[...], w1h_ref[...], preferred_element_type=jnp.float32,
                  precision=HIGHEST)
        + b1_ref[...]
    )
    h_new = jnp.tanh(pre)
    out = (
        jnp.dot(h_new, w2_ref[...], preferred_element_type=jnp.float32,
                precision=HIGHEST)
        + b2_ref[...]
    )
    hnew_ref[...] = h_new
    out_ref[...] = out


# ---------------------------------------------------------------------------
# Wrappers.
# ---------------------------------------------------------------------------
@jax.jit
def recognition_rnn_forward_sequence(x_seq, params):
    """forward_sequence: reverse-time RNN, h0 = zeros, one grid-less pallas_call.

    x_seq: (batch, seq, obs_dim).  Returns (out_last, h_last).
    """
    w_i2h, b_i2h, w_h2o, b_h2o = params
    batch, seq, obs_dim = x_seq.shape
    nhidden = w_i2h.shape[0]
    out_dim = w_h2o.shape[0]
    nh_pad = _round_up(nhidden, 128)
    out_pad = _round_up(out_dim, 128)
    f32 = jnp.float32

    # Split i2h along its input axis, pre-transpose to (in, out), zero-pad to
    # 128 lanes (fp-exact: padded hidden columns stay exactly 0 through tanh).
    w1x = jnp.pad(w_i2h[:, :obs_dim].T.astype(f32),
                  ((0, 0), (0, nh_pad - nhidden)))
    w1h = jnp.pad(w_i2h[:, obs_dim:].T.astype(f32),
                  ((0, nh_pad - nhidden), (0, nh_pad - nhidden)))
    b1 = jnp.pad(b_i2h.astype(f32), (0, nh_pad - nhidden))
    w2 = jnp.pad(w_h2o.T.astype(f32),
                 ((0, nh_pad - nhidden), (0, out_pad - out_dim)))
    b2 = jnp.pad(b_h2o.astype(f32), (0, out_pad - out_dim)).reshape(1, out_pad)

    # bf16x3 split of the recurrent weight (static per call).
    w1h_hi = w1h.astype(jnp.bfloat16)
    w1h_lo = (w1h - w1h_hi.astype(f32)).astype(jnp.bfloat16)

    # Hoisted input projection: one (seq*batch, obs_dim) x (obs_dim, nh_pad)
    # dot instead of seq tiny K=obs_dim dots on the serial critical path.
    x_t = jnp.transpose(x_seq, (1, 0, 2)).astype(f32)          # (seq, batch, obs)
    xproj = (
        jnp.dot(x_t.reshape(seq * batch, obs_dim), w1x, precision=HIGHEST) + b1
    ).reshape(seq, batch, nh_pad)

    out_p, hfin_p = pl.pallas_call(
        rnn_sequence_kernel,
        out_shape=(
            jax.ShapeDtypeStruct((batch, out_pad), f32),
            jax.ShapeDtypeStruct((batch, nh_pad), f32),
        ),
        in_specs=[_VMEM] * 5,
        out_specs=(_VMEM, _VMEM),
    )(xproj, w1h_hi, w1h_lo, w2, b2)

    return out_p[:, :out_dim], hfin_p[:, :nhidden]


def prepare_step_params(params, obs_dim):
    """Run ONCE outside a decode loop: transpose/split/reshape the weights eagerly."""
    w_i2h, b_i2h, w_h2o, b_h2o = params
    f32 = jnp.float32
    w1x = jnp.asarray(w_i2h[:, :obs_dim].T, f32)          # (obs_dim, nhidden)
    w1h = jnp.asarray(w_i2h[:, obs_dim:].T, f32)          # (nhidden, nhidden)
    b1 = jnp.asarray(b_i2h, f32).reshape(1, -1)           # (1, nhidden)
    w2 = jnp.asarray(w_h2o.T, f32)                        # (nhidden, out_dim)
    b2 = jnp.asarray(b_h2o, f32).reshape(1, -1)           # (1, out_dim)
    return w1x, w1h, b1, w2, b2


@functools.partial(jax.jit, donate_argnums=(1,))
def recognition_rnn_forward(x, h, prepared):
    """One RNN step: (out, h_new), same semantics as RecognitionRNN.forward.

    `h` is donated, so input_output_aliases={1: 1} gives a true in-place h update.
    """
    w1x, w1h, b1, w2, b2 = prepared
    batch = x.shape[0]
    nhidden = w1h.shape[0]
    out_dim = w2.shape[1]

    out, h_new = pl.pallas_call(
        rnn_step_kernel,
        out_shape=(
            jax.ShapeDtypeStruct((batch, out_dim), jnp.float32),
            jax.ShapeDtypeStruct((batch, nhidden), jnp.float32),
        ),
        in_specs=[_VMEM] * 7,
        out_specs=(_VMEM, _VMEM),
        input_output_aliases={1: 1},                       # reuse h's buffer for h_new
    )(x, h, w1x, w1h, b1, w2, b2)
    return out, h_new


def init_params(key, latent_dim=4, obs_dim=2, nhidden=25):
    """Deterministic init matching PyTorch nn.Linear default (U[-1/sqrt(fan_in), +])."""
    k1, k2, k3, k4 = jax.random.split(key, 4)
    fan1 = obs_dim + nhidden
    fan2 = nhidden
    w_i2h = jax.random.uniform(k1, (nhidden, fan1), jnp.float32,
                               -1.0 / jnp.sqrt(fan1), 1.0 / jnp.sqrt(fan1))
    b_i2h = jax.random.uniform(k2, (nhidden,), jnp.float32,
                               -1.0 / jnp.sqrt(fan1), 1.0 / jnp.sqrt(fan1))
    w_h2o = jax.random.uniform(k3, (latent_dim * 2, nhidden), jnp.float32,
                               -1.0 / jnp.sqrt(fan2), 1.0 / jnp.sqrt(fan2))
    b_h2o = jax.random.uniform(k4, (latent_dim * 2,), jnp.float32,
                               -1.0 / jnp.sqrt(fan2), 1.0 / jnp.sqrt(fan2))
    return w_i2h, b_i2h, w_h2o, b_h2o


if __name__ == "__main__":
    latent_dim, obs_dim, nhidden = 4, 2, 25
    batch, seq = 8, 8

    key = jax.random.PRNGKey(0)
    kp, kx = jax.random.split(key)
    params = init_params(kp, latent_dim=latent_dim, obs_dim=obs_dim, nhidden=nhidden)
    x_seq = jax.random.normal(kx, (batch, seq, obs_dim), dtype=jnp.float32)

    # Pure-JAX fp32 reference (mirrors the PyTorch module exactly).
    w_i2h, b_i2h, w_h2o, b_h2o = params

    def ref_step(x, h):
        combined = jnp.concatenate([x, h], axis=1)
        h_new = jnp.tanh(jnp.dot(combined, w_i2h.T, precision=HIGHEST) + b_i2h)
        out = jnp.dot(h_new, w_h2o.T, precision=HIGHEST) + b_h2o
        return out, h_new

    h0 = jnp.zeros((batch, nhidden), jnp.float32)

    # References first (the kernel step path donates its h argument).
    out1_ref, h1_ref = ref_step(x_seq[:, 0, :], h0)
    out_ref, h_ref = None, h0
    for t in reversed(range(seq)):
        out_ref, h_ref = ref_step(x_seq[:, t, :], h_ref)

    # One step (module.forward): weights prepared once, h donated.
    prepared = prepare_step_params(params, obs_dim)
    out1, h1 = recognition_rnn_forward(
        x_seq[:, 0, :], jnp.zeros((batch, nhidden), jnp.float32), prepared)

    # Fused forward_sequence (whole reverse-time loop inside one pallas_call).
    out_seq, h_fin = recognition_rnn_forward_sequence(x_seq, params)

    jax.block_until_ready((out1, h1, out_seq, h_fin))

    assert out_seq.shape == (batch, latent_dim * 2)
    assert h_fin.shape == (batch, nhidden)
    assert jnp.allclose(out1, out1_ref, atol=1e-4, rtol=1e-4)
    assert jnp.allclose(h1, h1_ref, atol=1e-4, rtol=1e-4)
    assert jnp.allclose(out_seq, out_ref, atol=1e-4, rtol=1e-4)
    assert jnp.allclose(h_fin, h_ref, atol=1e-4, rtol=1e-4)
    print("KERNEL_OK")
</pallas_src>

<mosaic_0001>
module attributes {stable_mosaic.version = 11 : i64} {
  func.func @rnn_step_kernel(%arg0: memref<8x2xf32, #tpu.memory_space<vmem>>, %arg1: memref<8x25xf32, #tpu.memory_space<vmem>>, %arg2: memref<2x25xf32, #tpu.memory_space<vmem>>, %arg3: memref<25x25xf32, #tpu.memory_space<vmem>>, %arg4: memref<1x25xf32, #tpu.memory_space<vmem>>, %arg5: memref<25x8xf32, #tpu.memory_space<vmem>>, %arg6: memref<1x8xf32, #tpu.memory_space<vmem>>, %arg7: memref<8x8xf32, #tpu.memory_space<vmem>>, %arg8: memref<8x25xf32, #tpu.memory_space<vmem>>) attributes {dimension_semantics = [], scalar_prefetch = 0 : i64, scratch_operands = 0 : i64, tpu.core_type = #tpu.core_type<tc>} {
    %c0 = arith.constant 0 : index
    %c0_0 = arith.constant 0 : index
    %0 = vector.load %arg0[%c0, %c0_0] : memref<8x2xf32, #tpu.memory_space<vmem>>, vector<8x2xf32>
    %c0_1 = arith.constant 0 : index
    %c0_2 = arith.constant 0 : index
    %1 = vector.load %arg2[%c0_1, %c0_2] : memref<2x25xf32, #tpu.memory_space<vmem>>, vector<2x25xf32>
    %cst = arith.constant dense<0.000000e+00> : vector<8x25xf32>
    %2 = tpu.matmul %0, %1, %cst {dimension_numbers = #tpu.dot_dimension_numbers<[1], [0], [0], [1], [0, 0, 1, 1], [], []>, precision = #tpu.contract_precision<fp32>} : vector<8x2xf32>, vector<2x25xf32>, vector<8x25xf32> -> vector<8x25xf32>
    %c0_3 = arith.constant 0 : index
    %c0_4 = arith.constant 0 : index
    %3 = vector.load %arg1[%c0_3, %c0_4] : memref<8x25xf32, #tpu.memory_space<vmem>>, vector<8x25xf32>
    %c0_5 = arith.constant 0 : index
    %c0_6 = arith.constant 0 : index
    %4 = vector.load %arg3[%c0_5, %c0_6] : memref<25x25xf32, #tpu.memory_space<vmem>>, vector<25x25xf32>
    %cst_7 = arith.constant dense<0.000000e+00> : vector<8x25xf32>
    %5 = tpu.matmul %3, %4, %cst_7 {dimension_numbers = #tpu.dot_dimension_numbers<[1], [0], [0], [1], [0, 0, 1, 1], [], []>, precision = #tpu.contract_precision<fp32>} : vector<8x25xf32>, vector<25x25xf32>, vector<8x25xf32> -> vector<8x25xf32>
    %6 = arith.addf %2, %5 : vector<8x25xf32>
    %c0_8 = arith.constant 0 : index
    %c0_9 = arith.constant 0 : index
    %7 = vector.load %arg4[%c0_8, %c0_9] : memref<1x25xf32, #tpu.memory_space<vmem>>, vector<1x25xf32>
    %8 = vector.broadcast %7 : vector<1x25xf32> to vector<8x25xf32>
    %9 = arith.addf %6, %8 : vector<8x25xf32>
    %10 = math.tanh %9 : vector<8x25xf32>
    %c0_10 = arith.constant 0 : index
    %c0_11 = arith.constant 0 : index
    %11 = vector.load %arg5[%c0_10, %c0_11] : memref<25x8xf32, #tpu.memory_space<vmem>>, vector<25x8xf32>
    %cst_12 = arith.constant dense<0.000000e+00> : vector<8x8xf32>
    %12 = tpu.matmul %10, %11, %cst_12 {dimension_numbers = #tpu.dot_dimension_numbers<[1], [0], [0], [1], [0, 0, 1, 1], [], []>, precision = #tpu.contract_precision<fp32>} : vector<8x25xf32>, vector<25x8xf32>, vector<8x8xf32> -> vector<8x8xf32>
    %c0_13 = arith.constant 0 : index
    %c0_14 = arith.constant 0 : index
    %13 = vector.load %arg6[%c0_13, %c0_14] : memref<1x8xf32, #tpu.memory_space<vmem>>, vector<1x8xf32>
    %14 = vector.broadcast %13 : vector<1x8xf32> to vector<8x8xf32>
    %15 = arith.addf %12, %14 : vector<8x8xf32>
    %c0_15 = arith.constant 0 : index
    %c0_16 = arith.constant 0 : index
    %16 = vector.load %arg8[%c0_15, %c0_16] : memref<8x25xf32, #tpu.memory_space<vmem>>, vector<8x25xf32>
    tpu.vector_store %arg8[%c0_15, %c0_16], %10 {strides = array<i32>} : memref<8x25xf32, #tpu.memory_space<vmem>>, vector<8x25xf32>,
    %c0_17 = arith.constant 0 : index
    %c0_18 = arith.constant 0 : index
    %17 = vector.load %arg7[%c0_17, %c0_18] : memref<8x8xf32, #tpu.memory_space<vmem>>, vector<8x8xf32>
    tpu.vector_store %arg7[%c0_17, %c0_18], %15 {strides = array<i32>} : memref<8x8xf32, #tpu.memory_space<vmem>>, vector<8x8xf32>,
    return
  }
}

</mosaic_0001>

<bundles_post_ra>
// kernel: recognition_rnn_forward.1
= control target key start
LH: loop header
LB: loop body
LE: loop exit
PB: predicated region body
PF: predicated region fallthrough
CT: control target
= control target key end

     0   :  { %14 = vsyncpa [#allocation3], 0  ;;  %s2224_s0 = inlined_call_operand.vmem [shape: f32[8,2], index: 0, kind: input, shape index: {}]   ;;  %s2225_s1 = inlined_call_operand.hbm [shape: f32[8,25], index: 1, kind: input, shape index: {}, may-alias: {1,8}]   ;;  %s2226_s2 = inlined_call_operand.vmem [shape: f32[2,25], index: 2, kind: input, shape index: {}]   ;;  %s2227_s3 = inlined_call_operand.vmem [shape: f32[25,25], index: 3, kind: input, shape index: {}]   ;;  %s2228_s4 = inlined_call_operand.vmem [shape: f32[1,25], index: 4, kind: input, shape index: {}]   ;;  %s2229_s5 = inlined_call_operand.vmem [shape: f32[25,8], index: 5, kind: input, shape index: {}]   ;;  %s2230_s6 = inlined_call_operand.vmem [shape: f32[1,8], index: 6, kind: input, shape index: {}]   ;;  %s2231_s7 = inlined_call_operand.hbm [shape: f32[8,8], index: 7, kind: output, shape index: {0}]   ;;  %s2232_s8 = inlined_call_operand.hbm [shape: f32[8,25], index: 8, kind: output, shape index: {1}, may-alias: {1,8}]  }
   0x1   :  { %15 = vsyncpa [#allocation4], 0 }
   0x2   :  { %16 = vsyncpa [#allocation7], 0  ;;  %s1938_s27 = smov [#allocation2]   ;;  %s1866_s9 = scalar_lea.hbm %s2225_s1, 128 }
   0x3   :  { %s25_s28 = sshll.u32 %s1938_s27, 4  ;;  %p1867_p0 = scmp.ne.s32.totalorder %s2225_s1, %s1866_s9  ;;  %s26_s28 = int_to_ptr.vmem [resolvable:$true] %s25_s28 }
   0x4   :  { %p1870_p1 = scmp.lt.u32.totalorder %s1866_s9, %s2225_s1 }
   0x6   :  { %p1872_p2 = pnand %p1870_p1, %p1867_p0 }
   0x8   :  { %1875 = shalt.err (!%p1872_p2)
}
   0x9   :  { %s1876_s14 = scalar_lea.vmem %s26_s28, 128  ;;  %p1881_p4 = scmp.lt.s32.totalorder %s26_s28, %s26_s28 }
   0xa   :  { %p1877_p3 = scmp.ne.s32.totalorder %s26_s28, %s1876_s14  ;;  %p1882_p5 = scmp.lt.s32.totalorder %s1876_s14, %s1876_s14 }
   0xc   :  { %p1883_p6 = por %p1882_p5, %p1881_p4 }
   0xe   :  { %p1884_p7 = pnand %p1883_p6, %p1877_p3 }
  0x10   :  { %1887 = shalt.err (!%p1884_p7)
}
  0x11   :  { %28 = dma.hbm_to_vmem [thread:$0]  %s2225_s1, 128, %s26_s28, [#allocation3]  }
  0x12   :  { %1932 = dma.done.wait [#allocation3], 128  }
  0x13   :  { %1933 = vsyncadd [#allocation3], 4294967168  ;;  %v1939_v0 = vmov 0.0|0.0   ;;  %vm1940_vm0 = vmmov 0   ;;  %v1941_v1 = vmov 0.0   ;;  %vm53_vm1 = vcmask 1040384  }
  0x14   :  { %1775 = vmatprep.subr.bf16.mxu1 %v1939_v0  ;;  %1621 = vmatprep.mubr.msk.f32.mxu1 %vm1940_vm0, %v1941_v1  ;;  %vm49_vm2 = vcmask 203776   ;;  %v45_v2 = vld [vmem:[%s2227_s3] sm:$0xff]  ;;  %v46_v3 = vld [vmem:[%s2227_s3 + $0x8] sm:$0xff]  ;;  %v47_v4 = vld [vmem:[%s2227_s3 + $0x10] sm:$0xff]  ;;  %vm546_vm3 = vcmask 1041408   ;;  %vm542_vm4 = vcmask 15360  }
  0x15   :  { %1679 = vmatprep.subr.mxu0 %v1941_v1  ;;  %1681 = vmatprep.mubr.msk.f32.mxu0 %vm1940_vm0, %v1941_v1  ;;  %v58_v5 = vand.u32 4294901760, %v45_v2  ;;  %v61_v6 = vand.u32 4294901760, %v46_v3  ;;  %v48_v7 = vld [vmem:[%s2227_s3 + $0x18] sm:$0x1]  ;;  %v64_v8 = vand.u32 4294901760, %v47_v4  ;;  %v44_v9 = vld [vmem:[#allocation2] sm:$0xff] }
  0x16   :  { %v55_v10 = vsel %vm53_vm1, %v48_v7, 0  ;;  %v51_v11 = vsel %vm49_vm2, %v44_v9, 0  ;;  %v43_v12 = vld [vmem:[%s2226_s2] sm:$0x3]  ;;  %v1008_v56 = vld [vmem:[%s2229_s5 + $0x18] sm:$0x1] }
  0x17   :  { %v2024_v13 = vpack.c.bf16 %v61_v6, %v58_v5  ;;  %v2026_v14 = vsub.f32 %v45_v2, %v58_v5  ;;  %v2028_v15 = vsub.f32 %v46_v3, %v61_v6  ;;  %v67_v16 = vand.u32 4294901760, %v55_v10  ;;  %v42_v30 = vld [vmem:[%s2224_s0] sm:$0xff]  ;;  %v1006_v59 = vld [vmem:[%s2229_s5 + $0x8] sm:$0xff]  ;;  %v1007_v62 = vld [vmem:[%s2229_s5 + $0x10] sm:$0xff] }
  0x18   :  { %v2030_v17 = vsub.f32 %v47_v4, %v64_v8  ;;  %v2032_v18 = vand.u32 4294901760, %v51_v11  ;;  %v548_v19 = vsel %vm546_vm3, %v43_v12, 0  ;;  %v544_v37 = vsel %vm542_vm4, %v42_v30, 0  ;;  %v1005_v58 = vld [vmem:[%s2229_s5] sm:$0xff] }
  0x19   :  { %1777 = vmatpush3.bf16.msra.mxu1 %v2024_v13  ;;  %v2035_v20 = vpack.c.bf16 %v67_v16, %v64_v8  ;;  %v2037_v21 = vsub.f32 %v55_v10, %v67_v16  ;;  %v139_v22 = vand.u32 4294901760, %v2026_v14  ;;  %v146_v23 = vand.u32 4294901760, %v2028_v15 }
  0x1a   :  { %1778 = vmatprep.subr.bf16.mxu1 %v1939_v0  ;;  %v127_v24 = vsub.f32 %v51_v11, %v2032_v18  ;;  %v153_v25 = vand.u32 4294901760, %v2030_v17  ;;  %v2044_v26 = vand.u32 4294901760, %v548_v19  ;;  %v2062_v41 = vand.u32 4294901760, %v544_v37 }
  0x1b   :  { %v140_v27 = vsub.f32 %v2026_v14, %v139_v22  ;;  %v147_v28 = vsub.f32 %v2028_v15, %v146_v23  ;;  %v160_v29 = vand.u32 4294901760, %v2037_v21  ;;  %v1788_v47 = vpack.c.bf16 %v2028_v15, %v2026_v14 }
  0x1c   :  { %v128_v31 = vand.u32 4294901760, %v127_v24  ;;  %v154_v32 = vsub.f32 %v2030_v17, %v153_v25  ;;  %1680 = vmatpush3.msra.mxu0 %v2044_v26  ;;  %v617_v43 = vsub.f32 %v544_v37, %v2062_v41  ;;  %v628_v49 = vsub.f32 %v548_v19, %v2044_v26 }
  0x1d   :  { %1780 = vmatpush3.bf16.msra.mxu1 %v2035_v20  ;;  %v141_v33 = vand.u32 4294901760, %v140_v27  ;;  %v148_v34 = vand.u32 4294901760, %v147_v28  ;;  %v161_v35 = vsub.f32 %v2037_v21, %v160_v29  ;;  %1689 = vmatprep.subr.mxu0 %v1941_v1  ;;  %v1791_v50 = vpack.c.bf16 %v2037_v21, %v2030_v17 }
  0x1e   :  { %v129_v36 = vsub.f32 %v127_v24, %v128_v31  ;;  %1781 = vmatprep.subr.bf16.mxu1 %v1939_v0  ;;  %v155_v39 = vand.u32 4294901760, %v154_v32  ;;  %v618_v45 = vand.u32 4294901760, %v617_v43  ;;  %v629_v51 = vand.u32 4294901760, %v628_v49 }
  0x1f   :  { %v1782_v38 = vpack.c.bf16 %v148_v34, %v141_v33  ;;  %v162_v40 = vand.u32 4294901760, %v161_v35  ;;  %v1800_v52 = vpack.c.bf16 %v146_v23, %v139_v22  ;;  %v1803_v53 = vpack.c.bf16 %v160_v29, %v153_v25 }
  0x20   :  { %v130_v42 = vand.u32 4294901760, %v129_v36  ;;  %v619_v46 = vsub.f32 %v617_v43, %v618_v45  ;;  %v630_v54 = vsub.f32 %v628_v49, %v629_v51  ;;  %v1020_v57 = vsel %vm53_vm1, %v1008_v56, 0 }
  0x21   :  { %v1785_v44 = vpack.c.bf16 %v162_v40, %v155_v39  ;;  %v1023_v60 = vand.u32 4294901760, %v1005_v58  ;;  %v1026_v61 = vand.u32 4294901760, %v1006_v59  ;;  %v1032_v63 = vand.u32 4294901760, %v1020_v57 }
  0x22   :  { %1622 = vmatmul.mubr.f32.vlgmr.msra.gmra.mrb[0].mxu1 %v130_v42  ;;  %v620_v48 = vand.u32 4294901760, %v619_v46  ;;  %v631_v55 = vand.u32 4294901760, %v630_v54  ;;  %v1029_v2 = vand.u32 4294901760, %v1007_v62 }
  0x23   :  { %1783 = vmatpush3.bf16.msra.mxu1 %v1782_v38  ;;  %1632 = vmatprep.mubr.msk.f32.mxu1 %vm1940_vm0, %v1941_v1  ;;  %v2135_v3 = vpack.c.bf16 %v1026_v61, %v1023_v60  ;;  %v2137_v4 = vsub.f32 %v1005_v58, %v1023_v60  ;;  %v2139_v5 = vsub.f32 %v1006_v59, %v1026_v61  ;;  %v1539_v60 = vld [vmem:[%s2228_s4] ss:$0 sm:$0xff]  ;;  %s1942_s4 = smov [#allocation6]  }
  0x24   :  { %1784 = vmatprep.subr.bf16.mxu1 %v1939_v0  ;;  %1682 = vmatmul.mubr.f32.vlgmr.msra.gmra.mrb[0].mxu0 %v620_v48  ;;  %v2141_v6 = vsub.f32 %v1020_v57, %v1032_v63  ;;  %v2143_v7 = vsub.f32 %v1007_v62, %v1029_v2  ;;  %v2146_v8 = vpack.c.bf16 %v1032_v63, %v1029_v2  ;;  %s1526_s12 = sshll.u32 %s1942_s4, 4  ;;  %s1527_s12 = int_to_ptr.vmem [resolvable:$true] %s1526_s12 }
  0x25   :  { %1690 = vmatpush3.msra.mxu0 %v628_v49  ;;  %1691 = vmatprep.mubr.msk.f32.mxu0 %vm1940_vm0, %v1941_v1  ;;  %v1104_v9 = vand.u32 4294901760, %v2137_v4  ;;  %v1111_v10 = vand.u32 4294901760, %v2139_v5  ;;  %v1824_v23 = vpack.c.bf16 %v2139_v5, %v2137_v4  ;;  %s1888_s13 = scalar_lea.vmem %s1527_s12, 128  ;;  %p1893_p9 = scmp.lt.s32.totalorder %s1527_s12, %s1527_s12 }
  0x26   :  { %1699 = vmatprep.subr.mxu0 %v1941_v1  ;;  %v1118_v15 = vand.u32 4294901760, %v2143_v7  ;;  %v1125_v16 = vand.u32 4294901760, %v2141_v6  ;;  %p1889_p8 = scmp.ne.s32.totalorder %s1527_s12, %s1888_s13  ;;  %p1894_p10 = scmp.lt.s32.totalorder %s1888_s13, %s1888_s13 }
  0x27   :  { %1786 = vmatpush3.bf16.msra.mxu1 %v1785_v44  ;;  %v1105_v11 = vsub.f32 %v2137_v4, %v1104_v9  ;;  %v1112_v12 = vsub.f32 %v2139_v5, %v1111_v10  ;;  %v2163_v25 = vpack.c.bf16 %v1111_v10, %v1104_v9 }
  0x28   :  { %1787 = vmatprep.subr.bf16.mxu1 %v1939_v0  ;;  %1692 = vmatmul.mubr.f32.vlgmr.msra.gmra.mrb[2].mxu0 %v617_v43  ;;  %v1126_v19 = vsub.f32 %v2141_v6, %v1125_v16  ;;  %p1895_p11 = por %p1894_p10, %p1893_p9 }
  0x29   :  { %1700 = vmatpush3.msra.mxu0 %v629_v51  ;;  %1701 = vmatprep.mubr.msk.f32.mxu0 %vm1940_vm0, %v1941_v1  ;;  %v1113_v14 = vand.u32 4294901760, %v1112_v12 }
  0x2a   :  { %1633 = vmatmul.mubr.f32.vlgmr.msra.gmra.mrb[2].mxu1 %v2032_v18  ;;  %1811 = vmatprep.subr.bf16.mxu0 %v1939_v0  ;;  %v1127_v21 = vand.u32 4294901760, %v1126_v19  ;;  %p1896_p12 = pnand %p1895_p11, %p1889_p8 }
  0x2b   :  { %1789 = vmatpush3.bf16.msra.mxu1 %v1788_v47  ;;  %1643 = vmatprep.mubr.msk.f32.mxu1 %vm1940_vm0, %v1941_v1 }
  0x2c   :  { %1790 = vmatprep.subr.bf16.mxu1 %v1939_v0  ;;  %1702 = vmatmul.mubr.f32.vlgmr.msra.gmra.mrb[4].mxu0 %v2062_v41 }
  0x2d   :  { %1717 = vmatprep.mubr.msk.f32.mxu0 %vm1940_vm0, %v1941_v1  ;;  %1813 = vmatpush3.bf16.msra.mxu0 %v2135_v3 }
  0x2e   :  { %1814 = vmatprep.subr.bf16.mxu0 %v1939_v0 }
  0x2f   :  { %1792 = vmatpush3.bf16.msra.mxu1 %v1791_v50 }
  0x30   :  { %1793 = vmatprep.subr.bf16.mxu1 %v1939_v0 }
  0x31   :  { %1816 = vmatpush3.bf16.msra.mxu0 %v2146_v8 }
  0x32   :  { %1644 = vmatmul.mubr.f32.vlgmr.msra.gmra.mrb[4].mxu1 %v127_v24  ;;  %1817 = vmatprep.subr.bf16.mxu0 %v1939_v0  ;;  %v1827_v24 = vpack.c.bf16 %v2141_v6, %v2143_v7 }
  0x33   :  { %1795 = vmatpush3.bf16.msra.mxu1 %v2024_v13  ;;  %1654 = vmatprep.mubr.msk.f32.mxu1 %vm1940_vm0, %v1941_v1 }
  0x34   :  { %1796 = vmatprep.subr.bf16.mxu1 %v1939_v0 }
  0x37   :  { %1798 = vmatpush3.bf16.msra.mxu1 %v2035_v20 }
  0x38   :  { %1799 = vmatprep.subr.bf16.mxu1 %v1939_v0 }
  0x3a   :  { %1655 = vmatmul.mubr.f32.vlgmr.msra.gmra.mrb[6].mxu1 %v128_v31 }
  0x3b   :  { %1801 = vmatpush3.bf16.msra.mxu1 %v1800_v52  ;;  %1665 = vmatprep.mubr.msk.f32.mxu1 %vm1940_vm0, %v1941_v1 }
  0x3c   :  { %1802 = vmatprep.subr.bf16.mxu1 %v1939_v0 }
  0x3f   :  { %1804 = vmatpush3.bf16.msra.mxu1 %v1803_v53 }
  0x40   :  { %1805 = vmatprep.subr.bf16.mxu1 %v1939_v0 }
  0x42   :  { %1666 = vmatmul.mubr.f32.vlgmr.msra.gmra.mrb[8].mxu1 %v2032_v18 }
  0x43   :  { %1807 = vmatpush3.bf16.msra.mxu1 %v2024_v13  ;;  %1676 = vmatprep.mubr.msk.f32.mxu1 %vm1940_vm0, %v1941_v1  ;;  %v1106_v13 = vand.u32 4294901760, %v1105_v11 }
  0x44   :  { %1808 = vmatprep.subr.bf16.mxu1 %v1939_v0 }
  0x45   :  { %v1818_v17 = vpack.c.bf16 %v1113_v14, %v1106_v13 }
  0x47   :  { %1810 = vmatpush3.bf16.msra.mxu1 %v2035_v20 }
  0x48   :  { %1684 = vmatprep.subr.mxu1 %v1941_v1 }
  0x4a   :  { %1677 = vmatmul.mubr.f32.vlgmr.msra.gmra.mrb[10].mxu1 %v2032_v18  ;;  %v1119_v18 = vsub.f32 %v2143_v7, %v1118_v15 }
  0x4b   :  { %1685 = vmatpush3.msra.mxu1 %v631_v55  ;;  %1686 = vmatprep.mubr.msk.f32.mxu1 %vm1940_vm0, %v1941_v1 }
  0x4c   :  { %1694 = vmatprep.subr.mxu1 %v1941_v1  ;;  %v1120_v20 = vand.u32 4294901760, %v1119_v18 }
  0x4e   :  { %1687 = vmatmul.mubr.f32.vlgmr.msra.gmra.mrb[12].mxu1 %v2062_v41  ;;  %v1821_v22 = vpack.c.bf16 %v1127_v21, %v1120_v20 }
  0x4f   :  { %1695 = vmatpush3.msra.mxu1 %v2044_v26  ;;  %1696 = vmatprep.mubr.msk.f32.mxu1 %vm1940_vm0, %v1941_v1 }
  0x50   :  { %1704 = vmatprep.subr.mxu1 %v1941_v1 }
  0x52   :  { %1697 = vmatmul.mubr.f32.vlgmr.msra.gmra.mrb[14].mxu1 %v618_v45 }
  0x53   :  { %1705 = vmatpush3.msra.mxu1 %v2044_v26  ;;  %1706 = vmatprep.mubr.msk.f32.mxu1 %vm1940_vm0, %v1941_v1  ;;  %v2165_v26 = vpack.c.bf16 %v1125_v16, %v1118_v15 }
  0x56   :  { %1707 = vmatmul.mubr.f32.vlgmr.msra.gmra.mrb[16].mxu1 %v2062_v41 }
  0xf5   :  { %v132_v27 = vpop.f32.mrb[0].mxu1 }
  0xf6   :  { %v1623_v28 = vpop.f32.mrb[1].mxu1 }
  0xf7   :  { %v622_v29 = vpop.f32.mrb[0].mxu0 }
  0xf8   :  { %v1683_v31 = vpop.f32.mrb[1].mxu0 }
  0xfb   :  { %v772_v34 = vpop.f32.mrb[2].mxu0 }
  0xfc   :  { %v1693_v35 = vpop.f32.mrb[3].mxu0 }
  0xfd   :  { %v223_v30 = vpop.f32.mrb[2].mxu1 }
  0xfe   :  { %v224_v32 = vadd.f32 %v223_v30, %v132_v27  ;;  %v1634_v33 = vpop.f32.mrb[3].mxu1 }
  0xff   :  { %v920_v36 = vpop.f32.mrb[4].mxu0 }
 0x100   :  { %v1703_v38 = vpop.f32.mrb[5].mxu0 }
 0x105   :  { %v303_v37 = vpop.f32.mrb[4].mxu1 }
 0x106   :  { %v304_v39 = vadd.f32 %v303_v37, %v224_v32  ;;  %v1645_v40 = vpop.f32.mrb[5].mxu1 }
 0x10d   :  { %v380_v41 = vpop.f32.mrb[6].mxu1 }
 0x10e   :  { %v381_v42 = vadd.f32 %v380_v41, %v304_v39  ;;  %v1656_v43 = vpop.f32.mrb[7].mxu1 }
 0x115   :  { %v463_v44 = vpop.f32.mrb[8].mxu1 }
 0x116   :  { %v464_v45 = vadd.f32 %v463_v44, %v381_v42  ;;  %v1667_v46 = vpop.f32.mrb[9].mxu1 }
 0x11d   :  { %v538_v47 = vpop.f32.mrb[10].mxu1 }
 0x11e   :  { %v539_v48 = vadd.f32 %v538_v47, %v464_v45  ;;  %v1678_v49 = vpop.f32.mrb[11].mxu1 }
 0x120   :  { %v623_v50 = vadd.f32 %v622_v29, %v539_v48 }
 0x121   :  { %v698_v51 = vpop.f32.mrb[12].mxu1 }
 0x122   :  { %v699_v52 = vadd.f32 %v698_v51, %v623_v50  ;;  %v1688_v53 = vpop.f32.mrb[13].mxu1 }
 0x124   :  { %v773_v54 = vadd.f32 %v772_v34, %v699_v52 }
 0x125   :  { %v846_v55 = vpop.f32.mrb[14].mxu1 }
 0x126   :  { %v847_v56 = vadd.f32 %v846_v55, %v773_v54  ;;  %v1698_v57 = vpop.f32.mrb[15].mxu1 }
 0x128   :  { %v921_v58 = vadd.f32 %v920_v36, %v847_v56 }
 0x129   :  { %v992_v59 = vpop.f32.mrb[16].mxu1 }
 0x12a   :  { %v993_v61 = vadd.f32 %v992_v59, %v921_v58  ;;  %v1708_v62 = vpop.f32.mrb[17].mxu1 }
 0x12c   :  { %v1003_v63 = vadd.f32 %v1539_v60, %v993_v61 }
 0x12e   :  { %1864 = vtanh.f32 %v1003_v63 }
 0x138   :  { %v1865_v2 = vpop.eup %1864 }
 0x139   :  { %1507 = vst.msk [vmem:[#allocation6] sm:$0xff] %vm49_vm2, %v1865_v2  ;;  %v1017_v4 = vsel %vm49_vm2, %v1865_v2, 0 }
 0x13a   :  { %v1091_v5 = vand.u32 4294901760, %v1017_v4 }
 0x13c   :  { %v1092_v6 = vsub.f32 %v1017_v4, %v1091_v5 }
 0x13e   :  { %v1093_v7 = vand.u32 4294901760, %v1092_v6 }
 0x140   :  { %v1094_v9 = vsub.f32 %v1092_v6, %v1093_v7 }
 0x142   :  { %v1095_v10 = vand.u32 4294901760, %v1094_v9 }
 0x144   :  { %1718 = vmatmul.mubr.f32.vlgmr.msra.gmra.mrb[6].mxu0 %v1095_v10 }
 0x145   :  { %1819 = vmatpush3.bf16.msra.mxu0 %v1818_v17  ;;  %1728 = vmatprep.mubr.msk.f32.mxu0 %vm1940_vm0, %v1941_v1 }
 0x146   :  { %1820 = vmatprep.subr.bf16.mxu0 %v1939_v0 }
 0x149   :  { %1822 = vmatpush3.bf16.msra.mxu0 %v1821_v22 }
 0x14a   :  { %1823 = vmatprep.subr.bf16.mxu0 %v1939_v0 }
 0x14c   :  { %1729 = vmatmul.mubr.f32.vlgmr.msra.gmra.mrb[6].mxu0 %v1091_v5 }
 0x14d   :  { %1825 = vmatpush3.bf16.msra.mxu0 %v1824_v23  ;;  %1739 = vmatprep.mubr.msk.f32.mxu0 %vm1940_vm0, %v1941_v1 }
 0x14e   :  { %1826 = vmatprep.subr.bf16.mxu0 %v1939_v0 }
 0x151   :  { %1828 = vmatpush3.bf16.msra.mxu0 %v1827_v24 }
 0x152   :  { %1829 = vmatprep.subr.bf16.mxu0 %v1939_v0 }
 0x154   :  { %1740 = vmatmul.mubr.f32.vlgmr.msra.gmra.mrb[6].mxu0 %v1092_v6 }
 0x155   :  { %1831 = vmatpush3.bf16.msra.mxu0 %v2135_v3  ;;  %1750 = vmatprep.mubr.msk.f32.mxu0 %vm1940_vm0, %v1941_v1 }
 0x156   :  { %1832 = vmatprep.subr.bf16.mxu0 %v1939_v0 }
 0x159   :  { %1834 = vmatpush3.bf16.msra.mxu0 %v2146_v8 }
 0x15a   :  { %1835 = vmatprep.subr.bf16.mxu0 %v1939_v0 }
 0x15c   :  { %1751 = vmatmul.mubr.f32.vlgmr.msra.gmra.mrb[6].mxu0 %v1093_v7 }
 0x15d   :  { %1837 = vmatpush3.bf16.msra.mxu0 %v2163_v25  ;;  %1761 = vmatprep.mubr.msk.f32.mxu0 %vm1940_vm0, %v1941_v1 }
 0x15e   :  { %1838 = vmatprep.subr.bf16.mxu0 %v1939_v0 }
 0x161   :  { %1840 = vmatpush3.bf16.msra.mxu0 %v2165_v26 }
 0x162   :  { %1841 = vmatprep.subr.bf16.mxu0 %v1939_v0 }
 0x164   :  { %1762 = vmatmul.mubr.f32.vlgmr.msra.gmra.mrb[6].mxu0 %v1091_v5 }
 0x165   :  { %1843 = vmatpush3.bf16.msra.mxu0 %v2135_v3  ;;  %1772 = vmatprep.mubr.msk.f32.mxu0 %vm1940_vm0, %v1941_v1 }
 0x166   :  { %1844 = vmatprep.subr.bf16.mxu0 %v1939_v0 }
 0x169   :  { %1846 = vmatpush3.bf16.msra.mxu0 %v2146_v8 }
 0x16c   :  { %1773 = vmatmul.mubr.f32.vlgmr.msra.gmra.mrb[6].mxu0 %v1091_v5 }
 0x16d   :  { %1899 = shalt.err (!%p1896_p12)
}
 0x16e   :  { %s1900_s16 = scalar_lea.hbm %s2232_s8, 128 }
 0x16f   :  { %p1901_p13 = scmp.ne.s32.totalorder %s2232_s8, %s1900_s16  ;;  %p1904_p0 = scmp.lt.u32.totalorder %s1900_s16, %s2232_s8 }
 0x171   :  { %p1906_p1 = pnand %p1904_p0, %p1901_p13 }
 0x173   :  { %1909 = shalt.err (!%p1906_p1)
}
 0x174   :  { %1529 = dma.vmem_to_hbm [thread:$0]  %s1527_s12, 128, %s2232_s8, [#allocation7]   ;;  %v1540_v0 = vld [vmem:[%s2230_s6] ss:$0 sm:$0xff]  ;;  %vm1508_vm5 = vcmask 64512  }
 0x175   :  { %s1943_s24 = smov [#allocation5]  }
 0x176   :  { %s1516_s25 = sshll.u32 %s1943_s24, 4  ;;  %s1517_s25 = int_to_ptr.vmem [resolvable:$true] %s1516_s25 }
 0x177   :  { %s1910_s2 = scalar_lea.vmem %s1517_s25, 128  ;;  %p1915_p3 = scmp.lt.s32.totalorder %s1517_s25, %s1517_s25 }
 0x178   :  { %p1911_p2 = scmp.ne.s32.totalorder %s1517_s25, %s1910_s2  ;;  %p1916_p4 = scmp.lt.s32.totalorder %s1910_s2, %s1910_s2 }
 0x17a   :  { %p1917_p5 = por %p1916_p4, %p1915_p3 }
 0x17c   :  { %p1918_p6 = pnand %p1917_p5, %p1911_p2 }
 0x23f   :  { %v1503_v1 = vpop.f32.mrb[6].mxu0 }
 0x240   :  { %v1847_v3 = vadd.f32 %v1540_v0, %v1503_v1  ;;  %v1774_v8 = vpop.f32.mrb[7].mxu0 }
 0x242   :  { %1509 = vst.msk [vmem:[#allocation5] sm:$0xff] %vm1508_vm5, %v1847_v3 }
 0x243   :  { %1921 = shalt.err (!%p1918_p6)
}
 0x244   :  { %s1922_s0 = scalar_lea.hbm %s2231_s7, 128 }
 0x245   :  { %p1923_p7 = scmp.ne.s32.totalorder %s2231_s7, %s1922_s0  ;;  %p1926_p8 = scmp.lt.u32.totalorder %s1922_s0, %s2231_s7 }
 0x247   :  { %p1928_p9 = pnand %p1926_p8, %p1923_p7 }
 0x249   :  { %1931 = shalt.err (!%p1928_p9)
}
 0x24a   :  { %1519 = dma.vmem_to_hbm [thread:$0]  %s1517_s25, 128, %s2231_s7, [#allocation4]  }
 0x24b   :  { %1934 = dma.done.wait [#allocation4], 128  }
 0x24c   :  { %1935 = vsyncadd [#allocation4], 4294967168 }
 0x24d   :  { %1936 = dma.done.wait [#allocation7], 128  }
 0x24e   :  { %1937 = vsyncadd [#allocation7], 4294967168 }
 0x24f   :  { %1536 = vsyncpa [#allocation3], 1 }
 0x250   :  { %1537 = vsyncpa [#allocation4], 1 }
 0x251   :  { %1538 = vsyncpa [#allocation7], 1 }

</bundles_post_ra>
